<compile_context>
chip_gen: v7x
topology: tpu7x:2x2x1
jax: 0.10.0
libtpu: 0.0.40
codegen_flags: <defaults>
</compile_context>

<pallas_src>
import functools

import jax
import jax.numpy as jnp
from jax import lax
from jax.experimental import pallas as pl
from jax.experimental.pallas import tpu as pltpu

_LANE = 128
_TARGET_BLOCK_BYTES = 4 << 20      # ~4 MiB per input block (per pipeline buffer)
_MAX_TILE_M = 2048                 # sublane-tile cap (rows of 128 lanes)
_VMEM_CAP = 48 << 20               # safe on v7x (64 MiB physical); >> v5e default


def _cdiv(a, b):
    return -(-a // b)


def _round_up(a, b):
    return _cdiv(a, b) * b


def _plan_tiling(N, C, M, itemsize, max_tile_m=None):
    """Pick (tile_m, num_tiles, n_outer, n_inner, vmem_need_bytes)."""
    # dtype-native sublane multiple: f32->8, bf16->16, 8-bit->32.
    mult = {4: 8, 2: 16, 1: 32}.get(itemsize, 8)

    raw = _TARGET_BLOCK_BYTES // max(1, C * _LANE * itemsize)
    cap = _MAX_TILE_M if max_tile_m is None else max_tile_m
    tile_m = min(raw, cap)
    tile_m = max(mult, (tile_m // mult) * mult)

    def vmem_need(tm):
        block = C * tm * _LANE * itemsize          # one input block
        temps = 18 * tm * _LANE * 4                # loop carries + slack (f32)
        return 2 * 2 * block + temps + (2 << 20)   # 2 inputs x 2 pipeline bufs

    # Shrink the tile if the budget would not fit the per-generation cap.
    while tile_m > mult and vmem_need(tile_m) > _VMEM_CAP - (4 << 20):
        tile_m = max(mult, (tile_m // 2 // mult) * mult)

    if tile_m >= M:
        tile_m = M                                 # full extent: always legal
    num_tiles = _cdiv(M, tile_m)

    # v7x megacore: both TensorCores need parallel grid work.  If N is odd the
    # batch axis alone can leave a core idle, so split the spatial tiles too.
    n_outer = 1
    if N % 2 == 1:
        if num_tiles == 1 and M >= 2 * mult:
            tile_m = _round_up(_cdiv(M, 2), mult)
            num_tiles = _cdiv(M, tile_m)
        if num_tiles >= 2:
            n_outer = 2
    n_inner = _cdiv(num_tiles, n_outer)

    return tile_m, num_tiles, n_outer, n_inner, vmem_need(tile_m)


def _pmd_kernel(ys_ref, yt_ref, out_ref, acc_ref, *,
                inv_tau, num_channels, n_inner, tile_m, m_valid, needs_mask):
    """Blocks are (C, tile_m, 128); channel reductions are elementwise (VPU)."""
    o = pl.program_id(1)
    i = pl.program_id(2)

    @pl.when(i == 0)
    def _():
        acc_ref[...] = jnp.zeros_like(acc_ref)

    shape = acc_ref.shape                       # (tile_m, 128)
    unrolled = num_channels <= 16               # tiny C: unroll at trace time

    def load(ref, c):
        return ref[c].astype(jnp.float32)

    # ---- pass 1: per-pixel channel max (student & teacher) -----------------
    def max_body(c, carry):
        s_max, t_max = carry
        return (jnp.maximum(s_max, load(ys_ref, c)),
                jnp.maximum(t_max, load(yt_ref, c)))

    neg_inf = jnp.full(shape, -jnp.inf, jnp.float32)
    carry = (neg_inf, neg_inf)
    if unrolled:
        for c in range(num_channels):
            carry = max_body(c, carry)
    else:
        carry = lax.fori_loop(0, num_channels, max_body, carry)
    s_max, t_max = carry

    # ---- pass 2: shifted exp-sums + sum_c exp(t_shift)*(t_shift - s_shift) --
    # (x - max(x)) * inv_tau == x*inv_tau - max(x*inv_tau) since inv_tau > 0.
    def sum_body(c, carry):
        s_sum, t_sum, dot = carry
        s_shift = (load(ys_ref, c) - s_max) * inv_tau
        t_shift = (load(yt_ref, c) - t_max) * inv_tau
        t_exp = jnp.exp(t_shift)
        return (s_sum + jnp.exp(s_shift),
                t_sum + t_exp,
                dot + t_exp * (t_shift - s_shift))

    zero = jnp.zeros(shape, jnp.float32)
    carry = (zero, zero, zero)
    if unrolled:
        for c in range(num_channels):
            carry = sum_body(c, carry)
    else:
        carry = lax.fori_loop(0, num_channels, sum_body, carry)
    s_sum, t_sum, dot = carry

    # Per-pixel KL:  dot/t_sum + log(s_sum) - log(t_sum) == dot*r + log(s_sum*r)
    # One log + one approx reciprocal on the EUP; the two Newton steps run on
    # the VPU (slack) and restore full f32 accuracy.  t_sum, s_sum >= 1.
    r = pl.reciprocal(t_sum, approx=True)
    r = r * (2.0 - t_sum * r)
    r = r * (2.0 - t_sum * r)
    kl = dot * r + jnp.log(s_sum * r)

    if needs_mask:
        # Ragged last tile (or clamped duplicate grid point): rows whose global
        # index is >= M hold garbage from the partial DMA -> zero them exactly.
        row = lax.broadcasted_iota(jnp.int32, shape, 0)
        valid = (o * n_inner + i) * tile_m + row < m_valid
        kl = jnp.where(valid, kl, 0.0)

    acc_ref[...] += kl

    @pl.when(i == pl.num_programs(2) - 1)
    def _():
        out_ref[...] = jnp.sum(acc_ref[...], keepdims=True)


def pmd_loss(preds_S, preds_T, *, tau=4, loss_weight=1.0, max_tile_m=None):
    """PMD loss.  preds_S, preds_T: (N, C, H, W) float (f32 or bf16) arrays.

    `max_tile_m` is an optional tiling override (testing / tuning only).
    """
    N, C, H, W = preds_S.shape
    assert preds_T.shape == preds_S.shape
    HW = H * W

    M = _cdiv(HW, _LANE)
    HW_128 = M * _LANE

    itemsize = jnp.dtype(preds_S.dtype).itemsize
    tile_m, num_tiles, n_outer, n_inner, vmem_need = _plan_tiling(
        N, C, M, itemsize, max_tile_m=max_tile_m)

    # Free reshape (NCHW is contiguous); no transpose, no extra HBM pass.
    ys = preds_S.reshape(N, C, HW)
    yt = preds_T.reshape(N, C, HW)
    if HW_128 != HW:
        # Layout-required pad only (< 128 columns): identical zero columns in
        # both tensors give identical uniform softmaxes -> exactly 0 KL.
        pad = HW_128 - HW
        ys = jnp.pad(ys, ((0, 0), (0, 0), (0, pad)))
        yt = jnp.pad(yt, ((0, 0), (0, 0), (0, pad)))
    ys = ys.reshape(N, C, M, _LANE)
    yt = yt.reshape(N, C, M, _LANE)

    needs_mask = (n_outer * n_inner * tile_m) != M
    clamp = (n_outer * n_inner) > num_tiles
    last_block = num_tiles - 1

    def tile_index(o, i):
        t = o * n_inner + i
        # At most one grid point can land past the last tile (odd tile count
        # split over two cores): clamp it to a valid block; the in-kernel row
        # mask zeroes its (duplicate) contribution.
        return jnp.minimum(t, last_block) if clamp else t

    kernel = functools.partial(
        _pmd_kernel,
        inv_tau=1.0 / float(tau),
        num_channels=C,
        n_inner=n_inner,
        tile_m=tile_m,
        m_valid=M,
        needs_mask=needs_mask,
    )

    in_spec = pl.BlockSpec((None, C, tile_m, _LANE),
                           lambda n, o, i: (n, 0, tile_index(o, i), 0))

    partials = pl.pallas_call(
        kernel,
        out_shape=jax.ShapeDtypeStruct((N, n_outer, 1, 1), jnp.float32),
        grid_spec=pltpu.PrefetchScalarGridSpec(
            num_scalar_prefetch=0,
            grid=(N, n_outer, n_inner),
            in_specs=[in_spec, in_spec],
            out_specs=pl.BlockSpec((None, None, 1, 1),
                                   lambda n, o, i: (n, o, 0, 0)),
            scratch_shapes=[pltpu.VMEM((tile_m, _LANE), jnp.float32)],
        ),
        compiler_params=pltpu.CompilerParams(
            dimension_semantics=("parallel", "parallel", "arbitrary"),
            vmem_limit_bytes=int(min(max(vmem_need, 32 << 20), _VMEM_CAP)),
        ),
    )(ys, yt)

    scale = float(loss_weight) * float(tau) ** 2 / float(N * HW)
    return jnp.sum(partials) * scale


def pmd_loss_ref(preds_S, preds_T, *, tau=4, loss_weight=1.0):
    """Pure-JAX reference mirroring the PyTorch code."""
    N, C, H, W = preds_S.shape
    log_p = jax.nn.log_softmax(preds_S / tau, axis=1)
    q = jax.nn.softmax(preds_T / tau, axis=1)
    kl = q * (jnp.log(q) - log_p)
    return loss_weight * jnp.sum(kl) / (N * H * W) * tau**2


if __name__ == "__main__":
    key = jax.random.PRNGKey(0)
    k1, k2, k3, k4 = jax.random.split(key, 4)

    # Primary check: student/teacher score maps, NCHW = (2, 4, 16, 16).
    N, C, H, W = 2, 4, 16, 16
    preds_S = jax.random.normal(k1, (N, C, H, W), dtype=jnp.float32)
    preds_T = jax.random.normal(k2, (N, C, H, W), dtype=jnp.float32)
    loss = jax.block_until_ready(
        pmd_loss(preds_S, preds_T, tau=4, loss_weight=1.0))
    ref = jax.block_until_ready(
        pmd_loss_ref(preds_S, preds_T, tau=4, loss_weight=1.0))
    assert jnp.allclose(loss, ref, rtol=1e-4, atol=1e-6), (loss, ref)

    # Secondary check: odd batch + non-128-aligned H*W + forced multi-tile grid
    # (exercises the ragged-tile row mask and the dual-TensorCore outer split).
    s2 = jax.random.normal(k3, (1, 3, 40, 40), dtype=jnp.float32)
    t2 = jax.random.normal(k4, (1, 3, 40, 40), dtype=jnp.float32)
    loss2 = jax.block_until_ready(
        pmd_loss(s2, t2, tau=2, loss_weight=0.5, max_tile_m=8))
    ref2 = jax.block_until_ready(pmd_loss_ref(s2, t2, tau=2, loss_weight=0.5))
    assert jnp.allclose(loss2, ref2, rtol=1e-4, atol=1e-6), (loss2, ref2)

    print("KERNEL_OK")
</pallas_src>

<mosaic_0001>
module attributes {stable_mosaic.version = 11 : i64} {
  func.func @_pmd_kernel(%arg0: i32, %arg1: i32, %arg2: i32, %arg3: memref<1x4x2x128xf32, #tpu.memory_space<vmem>>, %arg4: memref<1x4x2x128xf32, #tpu.memory_space<vmem>>, %arg5: memref<1x1x1x1xf32, #tpu.memory_space<vmem>>, %arg6: memref<2x128xf32, #tpu.memory_space<vmem>>) attributes {dimension_semantics = [#tpu.dimension_semantics<parallel>, #tpu.dimension_semantics<parallel>, #tpu.dimension_semantics<arbitrary>], iteration_bounds = array<i64: 2, 1, 1>, scalar_prefetch = 0 : i64, scratch_operands = 1 : i64, tpu.core_type = #tpu.core_type<tc>, window_params = [{transform_indices = @transform_0, window_bounds = array<i64: 1, 4, 2, 128>}, {transform_indices = @transform_1, window_bounds = array<i64: 1, 4, 2, 128>}, {transform_indices = @transform_2, window_bounds = array<i64: 1, 1, 1, 1>}]} {
    %c0_i32 = arith.constant 0 : i32
    %0 = arith.cmpi eq, %arg2, %c0_i32 : i32
    %1 = arith.extui %0 : i1 to i32
    %c0_i32_0 = arith.constant 0 : i32
    %2 = arith.cmpi ne, %1, %c0_i32_0 : i32
    scf.if %2 {
      %cst_78 = arith.constant 0.000000e+00 : f32
      %116 = vector.broadcast %cst_78 : f32 to vector<2x128xf32>
      %c0_79 = arith.constant 0 : index
      %c0_80 = arith.constant 0 : index
      %117 = vector.load %arg6[%c0_79, %c0_80] : memref<2x128xf32, #tpu.memory_space<vmem>>, vector<2x128xf32>
      tpu.vector_store %arg6[%c0_79, %c0_80], %116 {strides = array<i32>} : memref<2x128xf32, #tpu.memory_space<vmem>>, vector<2x128xf32>,
    } else {
    }
    %cst = arith.constant 0xFF800000 : f32
    %3 = vector.broadcast %cst : f32 to vector<2x128xf32>
    %c0 = arith.constant 0 : index
    %c0_1 = arith.constant 0 : index
    %c0_2 = arith.constant 0 : index
    %c0_3 = arith.constant 0 : index
    %4 = vector.load %arg3[%c0, %c0_1, %c0_2, %c0_3] : memref<1x4x2x128xf32, #tpu.memory_space<vmem>>, vector<1x1x2x128xf32>
    %5 = vector.shape_cast %4 : vector<1x1x2x128xf32> to vector<2x128xf32>
    %6 = arith.maximumf %3, %5 : vector<2x128xf32>
    %c0_4 = arith.constant 0 : index
    %c0_5 = arith.constant 0 : index
    %c0_6 = arith.constant 0 : index
    %c0_7 = arith.constant 0 : index
    %7 = vector.load %arg4[%c0_4, %c0_5, %c0_6, %c0_7] : memref<1x4x2x128xf32, #tpu.memory_space<vmem>>, vector<1x1x2x128xf32>
    %8 = vector.shape_cast %7 : vector<1x1x2x128xf32> to vector<2x128xf32>
    %9 = arith.maximumf %3, %8 : vector<2x128xf32>
    %c0_8 = arith.constant 0 : index
    %c1 = arith.constant 1 : index
    %c0_9 = arith.constant 0 : index
    %c0_10 = arith.constant 0 : index
    %10 = vector.load %arg3[%c0_8, %c1, %c0_9, %c0_10] : memref<1x4x2x128xf32, #tpu.memory_space<vmem>>, vector<1x1x2x128xf32>
    %11 = vector.shape_cast %10 : vector<1x1x2x128xf32> to vector<2x128xf32>
    %12 = arith.maximumf %6, %11 : vector<2x128xf32>
    %c0_11 = arith.constant 0 : index
    %c1_12 = arith.constant 1 : index
    %c0_13 = arith.constant 0 : index
    %c0_14 = arith.constant 0 : index
    %13 = vector.load %arg4[%c0_11, %c1_12, %c0_13, %c0_14] : memref<1x4x2x128xf32, #tpu.memory_space<vmem>>, vector<1x1x2x128xf32>
    %14 = vector.shape_cast %13 : vector<1x1x2x128xf32> to vector<2x128xf32>
    %15 = arith.maximumf %9, %14 : vector<2x128xf32>
    %c0_15 = arith.constant 0 : index
    %c2 = arith.constant 2 : index
    %c0_16 = arith.constant 0 : index
    %c0_17 = arith.constant 0 : index
    %16 = vector.load %arg3[%c0_15, %c2, %c0_16, %c0_17] : memref<1x4x2x128xf32, #tpu.memory_space<vmem>>, vector<1x1x2x128xf32>
    %17 = vector.shape_cast %16 : vector<1x1x2x128xf32> to vector<2x128xf32>
    %18 = arith.maximumf %12, %17 : vector<2x128xf32>
    %c0_18 = arith.constant 0 : index
    %c2_19 = arith.constant 2 : index
    %c0_20 = arith.constant 0 : index
    %c0_21 = arith.constant 0 : index
    %19 = vector.load %arg4[%c0_18, %c2_19, %c0_20, %c0_21] : memref<1x4x2x128xf32, #tpu.memory_space<vmem>>, vector<1x1x2x128xf32>
    %20 = vector.shape_cast %19 : vector<1x1x2x128xf32> to vector<2x128xf32>
    %21 = arith.maximumf %15, %20 : vector<2x128xf32>
    %c0_22 = arith.constant 0 : index
    %c3 = arith.constant 3 : index
    %c0_23 = arith.constant 0 : index
    %c0_24 = arith.constant 0 : index
    %22 = vector.load %arg3[%c0_22, %c3, %c0_23, %c0_24] : memref<1x4x2x128xf32, #tpu.memory_space<vmem>>, vector<1x1x2x128xf32>
    %23 = vector.shape_cast %22 : vector<1x1x2x128xf32> to vector<2x128xf32>
    %24 = arith.maximumf %18, %23 : vector<2x128xf32>
    %c0_25 = arith.constant 0 : index
    %c3_26 = arith.constant 3 : index
    %c0_27 = arith.constant 0 : index
    %c0_28 = arith.constant 0 : index
    %25 = vector.load %arg4[%c0_25, %c3_26, %c0_27, %c0_28] : memref<1x4x2x128xf32, #tpu.memory_space<vmem>>, vector<1x1x2x128xf32>
    %26 = vector.shape_cast %25 : vector<1x1x2x128xf32> to vector<2x128xf32>
    %27 = arith.maximumf %21, %26 : vector<2x128xf32>
    %cst_29 = arith.constant 0.000000e+00 : f32
    %28 = vector.broadcast %cst_29 : f32 to vector<2x128xf32>
    %c0_30 = arith.constant 0 : index
    %c0_31 = arith.constant 0 : index
    %c0_32 = arith.constant 0 : index
    %c0_33 = arith.constant 0 : index
    %29 = vector.load %arg3[%c0_30, %c0_31, %c0_32, %c0_33] : memref<1x4x2x128xf32, #tpu.memory_space<vmem>>, vector<1x1x2x128xf32>
    %30 = vector.shape_cast %29 : vector<1x1x2x128xf32> to vector<2x128xf32>
    %31 = arith.subf %30, %24 : vector<2x128xf32>
    %cst_34 = arith.constant 2.500000e-01 : f32
    %32 = vector.broadcast %cst_34 : f32 to vector<2x128xf32>
    %33 = arith.mulf %31, %32 : vector<2x128xf32>
    %c0_35 = arith.constant 0 : index
    %c0_36 = arith.constant 0 : index
    %c0_37 = arith.constant 0 : index
    %c0_38 = arith.constant 0 : index
    %34 = vector.load %arg4[%c0_35, %c0_36, %c0_37, %c0_38] : memref<1x4x2x128xf32, #tpu.memory_space<vmem>>, vector<1x1x2x128xf32>
    %35 = vector.shape_cast %34 : vector<1x1x2x128xf32> to vector<2x128xf32>
    %36 = arith.subf %35, %27 : vector<2x128xf32>
    %cst_39 = arith.constant 2.500000e-01 : f32
    %37 = vector.broadcast %cst_39 : f32 to vector<2x128xf32>
    %38 = arith.mulf %36, %37 : vector<2x128xf32>
    %39 = math.exp %38 : vector<2x128xf32>
    %40 = math.exp %33 : vector<2x128xf32>
    %41 = arith.addf %28, %40 : vector<2x128xf32>
    %42 = arith.addf %28, %39 : vector<2x128xf32>
    %43 = arith.subf %38, %33 : vector<2x128xf32>
    %44 = arith.mulf %39, %43 : vector<2x128xf32>
    %45 = arith.addf %28, %44 : vector<2x128xf32>
    %c0_40 = arith.constant 0 : index
    %c1_41 = arith.constant 1 : index
    %c0_42 = arith.constant 0 : index
    %c0_43 = arith.constant 0 : index
    %46 = vector.load %arg3[%c0_40, %c1_41, %c0_42, %c0_43] : memref<1x4x2x128xf32, #tpu.memory_space<vmem>>, vector<1x1x2x128xf32>
    %47 = vector.shape_cast %46 : vector<1x1x2x128xf32> to vector<2x128xf32>
    %48 = arith.subf %47, %24 : vector<2x128xf32>
    %cst_44 = arith.constant 2.500000e-01 : f32
    %49 = vector.broadcast %cst_44 : f32 to vector<2x128xf32>
    %50 = arith.mulf %48, %49 : vector<2x128xf32>
    %c0_45 = arith.constant 0 : index
    %c1_46 = arith.constant 1 : index
    %c0_47 = arith.constant 0 : index
    %c0_48 = arith.constant 0 : index
    %51 = vector.load %arg4[%c0_45, %c1_46, %c0_47, %c0_48] : memref<1x4x2x128xf32, #tpu.memory_space<vmem>>, vector<1x1x2x128xf32>
    %52 = vector.shape_cast %51 : vector<1x1x2x128xf32> to vector<2x128xf32>
    %53 = arith.subf %52, %27 : vector<2x128xf32>
    %cst_49 = arith.constant 2.500000e-01 : f32
    %54 = vector.broadcast %cst_49 : f32 to vector<2x128xf32>
    %55 = arith.mulf %53, %54 : vector<2x128xf32>
    %56 = math.exp %55 : vector<2x128xf32>
    %57 = math.exp %50 : vector<2x128xf32>
    %58 = arith.addf %41, %57 : vector<2x128xf32>
    %59 = arith.addf %42, %56 : vector<2x128xf32>
    %60 = arith.subf %55, %50 : vector<2x128xf32>
    %61 = arith.mulf %56, %60 : vector<2x128xf32>
    %62 = arith.addf %45, %61 : vector<2x128xf32>
    %c0_50 = arith.constant 0 : index
    %c2_51 = arith.constant 2 : index
    %c0_52 = arith.constant 0 : index
    %c0_53 = arith.constant 0 : index
    %63 = vector.load %arg3[%c0_50, %c2_51, %c0_52, %c0_53] : memref<1x4x2x128xf32, #tpu.memory_space<vmem>>, vector<1x1x2x128xf32>
    %64 = vector.shape_cast %63 : vector<1x1x2x128xf32> to vector<2x128xf32>
    %65 = arith.subf %64, %24 : vector<2x128xf32>
    %cst_54 = arith.constant 2.500000e-01 : f32
    %66 = vector.broadcast %cst_54 : f32 to vector<2x128xf32>
    %67 = arith.mulf %65, %66 : vector<2x128xf32>
    %c0_55 = arith.constant 0 : index
    %c2_56 = arith.constant 2 : index
    %c0_57 = arith.constant 0 : index
    %c0_58 = arith.constant 0 : index
    %68 = vector.load %arg4[%c0_55, %c2_56, %c0_57, %c0_58] : memref<1x4x2x128xf32, #tpu.memory_space<vmem>>, vector<1x1x2x128xf32>
    %69 = vector.shape_cast %68 : vector<1x1x2x128xf32> to vector<2x128xf32>
    %70 = arith.subf %69, %27 : vector<2x128xf32>
    %cst_59 = arith.constant 2.500000e-01 : f32
    %71 = vector.broadcast %cst_59 : f32 to vector<2x128xf32>
    %72 = arith.mulf %70, %71 : vector<2x128xf32>
    %73 = math.exp %72 : vector<2x128xf32>
    %74 = math.exp %67 : vector<2x128xf32>
    %75 = arith.addf %58, %74 : vector<2x128xf32>
    %76 = arith.addf %59, %73 : vector<2x128xf32>
    %77 = arith.subf %72, %67 : vector<2x128xf32>
    %78 = arith.mulf %73, %77 : vector<2x128xf32>
    %79 = arith.addf %62, %78 : vector<2x128xf32>
    %c0_60 = arith.constant 0 : index
    %c3_61 = arith.constant 3 : index
    %c0_62 = arith.constant 0 : index
    %c0_63 = arith.constant 0 : index
    %80 = vector.load %arg3[%c0_60, %c3_61, %c0_62, %c0_63] : memref<1x4x2x128xf32, #tpu.memory_space<vmem>>, vector<1x1x2x128xf32>
    %81 = vector.shape_cast %80 : vector<1x1x2x128xf32> to vector<2x128xf32>
    %82 = arith.subf %81, %24 : vector<2x128xf32>
    %cst_64 = arith.constant 2.500000e-01 : f32
    %83 = vector.broadcast %cst_64 : f32 to vector<2x128xf32>
    %84 = arith.mulf %82, %83 : vector<2x128xf32>
    %c0_65 = arith.constant 0 : index
    %c3_66 = arith.constant 3 : index
    %c0_67 = arith.constant 0 : index
    %c0_68 = arith.constant 0 : index
    %85 = vector.load %arg4[%c0_65, %c3_66, %c0_67, %c0_68] : memref<1x4x2x128xf32, #tpu.memory_space<vmem>>, vector<1x1x2x128xf32>
    %86 = vector.shape_cast %85 : vector<1x1x2x128xf32> to vector<2x128xf32>
    %87 = arith.subf %86, %27 : vector<2x128xf32>
    %cst_69 = arith.constant 2.500000e-01 : f32
    %88 = vector.broadcast %cst_69 : f32 to vector<2x128xf32>
    %89 = arith.mulf %87, %88 : vector<2x128xf32>
    %90 = math.exp %89 : vector<2x128xf32>
    %91 = math.exp %84 : vector<2x128xf32>
    %92 = arith.addf %75, %91 : vector<2x128xf32>
    %93 = arith.addf %76, %90 : vector<2x128xf32>
    %94 = arith.subf %89, %84 : vector<2x128xf32>
    %95 = arith.mulf %90, %94 : vector<2x128xf32>
    %96 = arith.addf %79, %95 : vector<2x128xf32>
    %97 = tpu.reciprocal %93 {approx = true} : vector<2x128xf32> -> vector<2x128xf32>
    %98 = arith.mulf %93, %97 : vector<2x128xf32>
    %cst_70 = arith.constant 2.000000e+00 : f32
    %99 = vector.broadcast %cst_70 : f32 to vector<2x128xf32>
    %100 = arith.subf %99, %98 : vector<2x128xf32>
    %101 = arith.mulf %97, %100 : vector<2x128xf32>
    %102 = arith.mulf %93, %101 : vector<2x128xf32>
    %cst_71 = arith.constant 2.000000e+00 : f32
    %103 = vector.broadcast %cst_71 : f32 to vector<2x128xf32>
    %104 = arith.subf %103, %102 : vector<2x128xf32>
    %105 = arith.mulf %101, %104 : vector<2x128xf32>
    %106 = arith.mulf %96, %105 : vector<2x128xf32>
    %107 = arith.mulf %92, %105 : vector<2x128xf32>
    %108 = math.log %107 : vector<2x128xf32>
    %109 = arith.addf %106, %108 : vector<2x128xf32>
    %c0_72 = arith.constant 0 : index
    %c0_73 = arith.constant 0 : index
    %110 = vector.load %arg6[%c0_72, %c0_73] : memref<2x128xf32, #tpu.memory_space<vmem>>, vector<2x128xf32>
    %111 = arith.addf %110, %109 : vector<2x128xf32>
    %c0_74 = arith.constant 0 : index
    %c0_75 = arith.constant 0 : index
    %112 = vector.load %arg6[%c0_74, %c0_75] : memref<2x128xf32, #tpu.memory_space<vmem>>, vector<2x128xf32>
    tpu.vector_store %arg6[%c0_74, %c0_75], %111 {strides = array<i32>} : memref<2x128xf32, #tpu.memory_space<vmem>>, vector<2x128xf32>,
    %c0_i32_76 = arith.constant 0 : i32
    %113 = arith.cmpi eq, %arg2, %c0_i32_76 : i32
    %114 = arith.extui %113 : i1 to i32
    %c0_i32_77 = arith.constant 0 : i32
    %115 = arith.cmpi ne, %114, %c0_i32_77 : i32
    scf.if %115 {
      %c0_78 = arith.constant 0 : index
      %c0_79 = arith.constant 0 : index
      %116 = vector.load %arg6[%c0_78, %c0_79] : memref<2x128xf32, #tpu.memory_space<vmem>>, vector<2x128xf32>
      %117 = vector.shape_cast %116 : vector<2x128xf32> to vector<1x2x128xf32>
      %cst_80 = arith.constant dense<0.000000e+00> : vector<1xf32>
      %118 = vector.multi_reduction <add>, %117, %cst_80 [1, 2] : vector<1x2x128xf32> to vector<1xf32>
      %119 = vector.shape_cast %118 : vector<1xf32> to vector<1x1x1xf32>
      %120 = vector.extract %119[0, 0, 0] : f32 from vector<1x1x1xf32>
      %121 = vector.broadcast %120 : f32 to vector<1x1xf32>
      %c0_81 = arith.constant 0 : index
      %c0_82 = arith.constant 0 : index
      %c0_83 = arith.constant 0 : index
      %c0_84 = arith.constant 0 : index
      %122 = vector.load %arg5[%c0_81, %c0_82, %c0_83, %c0_84] : memref<1x1x1x1xf32, #tpu.memory_space<vmem>>, vector<1x1x1x1xf32>
      %123 = vector.shape_cast %122 : vector<1x1x1x1xf32> to vector<1x1xf32>
      %124 = vector.shape_cast %121 : vector<1x1xf32> to vector<1x1x1x1xf32>
      tpu.vector_store %arg5[%c0_81, %c0_82, %c0_83, %c0_84], %124 {strides = array<i32>} : memref<1x1x1x1xf32, #tpu.memory_space<vmem>>, vector<1x1x1x1xf32>,
    } else {
    }
    return
  }
  func.func @transform_0(%arg0: i32, %arg1: i32, %arg2: i32) -> (i32, i32, i32, i32) {
    %c1_i32 = arith.constant 1 : i32
    %0 = arith.muli %arg1, %c1_i32 : i32
    %1 = arith.addi %0, %arg2 : i32
    %c0_i32 = arith.constant 0 : i32
    %c0_i32_0 = arith.constant 0 : i32
    %c0_i32_1 = arith.constant 0 : i32
    return %arg0, %c0_i32, %1, %c0_i32_0 : i32, i32, i32, i32
  }
  func.func @transform_1(%arg0: i32, %arg1: i32, %arg2: i32) -> (i32, i32, i32, i32) {
    %c1_i32 = arith.constant 1 : i32
    %0 = arith.muli %arg1, %c1_i32 : i32
    %1 = arith.addi %0, %arg2 : i32
    %c0_i32 = arith.constant 0 : i32
    %c0_i32_0 = arith.constant 0 : i32
    %c0_i32_1 = arith.constant 0 : i32
    return %arg0, %c0_i32, %1, %c0_i32_0 : i32, i32, i32, i32
  }
  func.func @transform_2(%arg0: i32, %arg1: i32, %arg2: i32) -> (i32, i32, i32, i32) {
    %c0_i32 = arith.constant 0 : i32
    %c0_i32_0 = arith.constant 0 : i32
    %c0_i32_1 = arith.constant 0 : i32
    return %arg0, %arg1, %c0_i32, %c0_i32_0 : i32, i32, i32, i32
  }
}

</mosaic_0001>

<bundles_post_ra>
// kernel: tpu_custom_call.1
= control target key start
LH: loop header
LB: loop body
LE: loop exit
PB: predicated region body
PF: predicated region fallthrough
CT: control target
= control target key end

     0   :  { %7 = vsyncpa [#allocation4], 0  ;;  %s888_s0 = inlined_call_operand.hbm [shape: f32[2,4,2,128], index: 0, kind: input, shape index: {}]   ;;  %s889_s1 = inlined_call_operand.hbm [shape: f32[2,4,2,128], index: 1, kind: input, shape index: {}]   ;;  %s890_s2 = inlined_call_operand.vmem [shape: f32[2,1,1,1], index: 2, kind: output, shape index: {}]  }
   0x1   :  { %9 = vsyncpa [#allocation4 + $0x1], 0 }
   0x2   :  { %10 = vsyncpa [#allocation6], 0 }
   0x3   :  { %12 = vsyncpa [#allocation6 + $0x1], 0  ;;  %s704_s9 = smov 0   ;;  %s706_s10 = smov 0  }
   0x4   :  { %s708_s11 = smov 0   ;;  %s710_s12 = smov 0  }
   0x5   :  { %s712_s13 = smov 0   ;;  %s714_s14 = smov 0  }
   0x6 LB: > { %s460_s15 = sadd.s32 4294967295, %s682_s14   ;;  %s37_s16 = sadd.s32 1, %s678_s13  ;;  %s682_s14 = sphi %s714_s14, %s18_s14   ;;  %s678_s13 = sphi %s712_s13, %s901_s13   ;;  %s674_s12 = sphi %s710_s12, %s900_s12   ;;  %s670_s11 = sphi %s708_s11, %s899_s11   ;;  %s666_s10 = sphi %s706_s10, %s898_s10   ;;  %s662_s9 = sphi %s704_s9, %s897_s9  }
   0x7   : > { %p39_p0 = scmp.ge.s32.totalorder %s37_s16, 2  ;;  %s48_s17 = sadd.s32 1, %s670_s11 }
   0x8   : > { %p55_p1 = scmp.ne.s32.totalorder %s670_s11, %s666_s10  ;;  %p56_p2 = scmp.eq.s32.totalorder %s682_s14, 0 }
   0x9   : > { %s903_s16 = smov (%p39_p0, %s37_s16), 0  ;;  %p61_p4 = scmp.ne.s32.totalorder %s666_s10, %s662_s9 }
   0xa   : > { %p740_p3 = por %p56_p2, %p55_p1  ;;  %s43_s19 = ssub.s32 %s678_s13, %s903_s16 }
   0xb   : > { %p62_p5 = scmp.eq.s32.totalorder %s460_s15, 0  ;;  %p46_p6 = scmp.eq.s32.totalorder %s43_s19, 0 }
   0xc   : > { %p496_p8 = scmp.lt.s32.totalorder %s682_s14, 2  ;;  %s756_s22 = sand.u32 1, %s670_s11  }
   0xd   : > { %p747_p7 = por %p62_p5, %p61_p4  ;;  %s481_s23 = sshll.u32 %s678_s13, 7 }
   0xe   : > { %s753_s21 = scalar_select %p46_p6, %s670_s11, %s48_s17  }
   0xf   : > { %s893_s20 = scalar_select %p747_p7, 1, 0 }
  0x10   : > { %s464_s24 = sshll.u32 %s756_s22, 3  ;;  %s765_s27 = scalar_lea.hbm %s888_s0, %s481_s23 }
  0x11   : > { %s147_s28 = scalar_lea.vmem [#allocation3], %s464_s24  ;;  %p771_p9 = pnand %p496_p8, %p740_p3 }
  0x12   : > { %s156_s29 = sshll.u32 %s147_s28, 4  ;;  %s144_s3 = scalar_lea.sflag [#allocation4], %s756_s22  ;;  %s775_s29 = int_to_ptr.vmem [resolvable:$true] %s156_s29 }
  0x13   : > { %s568_s4 = scalar_lea.hbm %s765_s27, 128  ;;  %p570_p11 = pneg %p771_p9 }
  0x14   : > { %p569_p10 = scmp.ne.s32.totalorder %s765_s27, %s568_s4  ;;  %s573_s7 = scalar_lea.hbm %s888_s0, 256 }
  0x15   : > { %p574_p0 = scmp.lt.u32.totalorder %s765_s27, %s888_s0  ;;  %p575_p1 = scmp.lt.u32.totalorder %s573_s7, %s568_s4 }
  0x16   : > { %p571_p12 = pnand %p570_p11, %p569_p10  ;;  %p577_p3 = scmp.lt.u32.totalorder %s568_s4, %s765_s27 }
  0x17   : > { %p576_p2 = por %p575_p1, %p574_p0 }
  0x18   : > { %p572_p13 = pneg %p571_p12 }
  0x19   : > { %p578_p4 = por %p577_p3, %p576_p2 }
  0x1b   : > { %p579_p5 = pnand %p578_p4, %p572_p13 }
  0x1d   : > { %582 = shalt.err (!%p579_p5)
}
  0x1e   : > { %s583_s15 = scalar_lea.vmem %s775_s29, 128  ;;  %s684_s17 = smov [#allocation3]  }
  0x1f   : > { %p584_p6 = scmp.ne.s32.totalorder %s775_s29, %s583_s15  ;;  %s588_s18 = sshll.u32 %s684_s17, 4  ;;  %s589_s18 = int_to_ptr.vmem [resolvable:$false] %s588_s18 }
  0x20   : > { %s590_s19 = scalar_lea.vmem %s589_s18, 256  ;;  %p591_p12 = scmp.lt.s32.totalorder %s775_s29, %s589_s18 }
  0x21   : > { %p586_p8 = pnand %p584_p6, %p570_p11  ;;  %p592_p0 = scmp.lt.s32.totalorder %s590_s19, %s583_s15 }
  0x23   : > { %p587_p10 = pneg %p586_p8  ;;  %p593_p1 = por %p592_p0, %p591_p12 }
  0x25   : > { %p594_p2 = pnand %p593_p1, %p587_p10 }
  0x27   : > { %597 = shalt.err (!%p594_p2)
}
  0x28   : > { %s685_s25 = smov 32   ;;  %s686_s26 = smov 2  }
  0x29   : > { %492 = dma.hbm_to_vmem [thread:$0]  (!%p771_p9), %s765_s27, 128, %s775_s29, %s144_s3, %s685_s25, %s685_s25, %s686_s26  }
  0x2a   : > { %p470_p13 = scmp.ge.s32.totalorder %s682_s14, 1  ;;  %p187_p3 = scmp.lt.s32.totalorder %s682_s14, 3 }
  0x2b   : > { %s819_s6 = scalar_lea.hbm %s889_s1, %s481_s23  ;;  %s170_s7 = scalar_lea.vmem [#allocation5], %s464_s24 }
  0x2c   : > { %p810_p4 = pnand %p470_p13, %p187_p3  ;;  %s179_s8 = sshll.u32 %s170_s7, 4  ;;  %s823_s8 = int_to_ptr.vmem [resolvable:$true] %s179_s8 }
  0x2d   : > { %s167_s27 = scalar_lea.sflag [#allocation6], %s756_s22  ;;  %s598_s29 = scalar_lea.hbm %s819_s6, 128 }
  0x2e   : > { %p599_p5 = scmp.ne.s32.totalorder %s819_s6, %s598_s29  ;;  %s603_s23 = scalar_lea.hbm %s889_s1, 256 }
  0x2f   : > { %p604_p10 = scmp.lt.u32.totalorder %s819_s6, %s889_s1  ;;  %p605_p12 = scmp.lt.u32.totalorder %s603_s23, %s598_s29 }
  0x30   : > { %p601_p6 = pnand %p599_p5, %p570_p11  ;;  %p607_p1 = scmp.lt.u32.totalorder %s598_s29, %s819_s6 }
  0x31   : > { %p606_p0 = por %p605_p12, %p604_p10 }
  0x32   : > { %p602_p8 = pneg %p601_p6 }
  0x33   : > { %p608_p2 = por %p607_p1, %p606_p0 }
  0x35   : > { %p609_p13 = pnand %p608_p2, %p602_p8 }
  0x37   : > { %612 = shalt.err (!%p609_p13)
}
  0x38   : > { %s613_s24 = scalar_lea.vmem %s823_s8, 128  ;;  %s687_s18 = smov [#allocation5]  }
  0x39   : > { %p614_p3 = scmp.ne.s32.totalorder %s823_s8, %s613_s24  ;;  %s618_s19 = sshll.u32 %s687_s18, 4  ;;  %s619_s19 = int_to_ptr.vmem [resolvable:$false] %s618_s19 }
  0x3a   : > { %s620_s4 = scalar_lea.vmem %s619_s19, 256  ;;  %p621_p7 = scmp.lt.s32.totalorder %s823_s8, %s619_s19 }
  0x3b   : > { %p616_p5 = pnand %p614_p3, %p570_p11  ;;  %p622_p10 = scmp.lt.s32.totalorder %s620_s4, %s613_s24 }
  0x3d   : > { %p617_p6 = pneg %p616_p5  ;;  %p623_p12 = por %p622_p10, %p621_p7 }
  0x3f   : > { %p624_p0 = pnand %p623_p12, %p617_p6 }
  0x41   : > { %627 = shalt.err (!%p624_p0)
}
  0x42   : > { %495 = dma.hbm_to_vmem [thread:$0]  (!%p771_p9), %s819_s6, 128, %s823_s8, %s167_s27, %s685_s25, %s685_s25, %s686_s26  }
  0x43   : > { %191 = sbr.rel (%p810_p4) target bundleno = 365 (0x16d), region = 28  ;;  %s193_s5 = sand.u32 (!%p810_p4), 1, %s666_s10  }
  0x44   : > { %s471_s7 = sshll.u32 (!%p810_p4), %s193_s5, 3  ;;  %s194_s29 = scalar_lea.sflag (!%p810_p4), [#allocation4], %s193_s5 }
  0x45   : > { %s197_s3 = scalar_lea.vmem (!%p810_p4), [#allocation3], %s471_s7  ;;  %p896_p7 = scmp.ne.s32.totalorder (!%p810_p4), %s893_s20, 0 }
  0x4a   : > { %653 = dma.done.wait (%p896_p7), %s194_s29, 128  }
  0x4b   : > { %655 = vsyncadd (%p896_p7), %s194_s29, 4294967168  ;;  %s203_s30 = scalar_lea.sflag [#allocation6], %s193_s5  ;;  %s206_s22 = scalar_lea.vmem [#allocation5], %s471_s7 }
  0x4c   : > { %657 = dma.done.wait (%p896_p7), %s203_s30, 128  }
  0x4d   : > { %659 = vsyncadd (%p896_p7), %s203_s30, 4294967168  ;;  %v688_v0 = vmov 0.0   ;;  %v247_v1 = vld [vmem:[%s206_s22] sm:$0x3]  ;;  %v474_v2 = vld [vmem:[%s206_s22 + $0x2] sm:$0x3] }
  0x4e   : > { %245 = vst [vmem:[#allocation2] sm:$0x3] %v688_v0  ;;  %v476_v3 = vld [vmem:[%s206_s22 + $0x4] sm:$0x3]  ;;  %v246_v4 = vld [vmem:[%s197_s3] sm:$0x3]  ;;  %v253_v6 = vmax.f32 %v247_v1, %v474_v2 }
  0x4f   : > { %v473_v5 = vld [vmem:[%s197_s3 + $0x2] sm:$0x3]  ;;  %v478_v7 = vld [vmem:[%s206_s22 + $0x6] sm:$0x3]  ;;  %v475_v10 = vld [vmem:[%s197_s3 + $0x4] sm:$0x3] }
  0x50   : > { %v259_v8 = vmax.f32 %v253_v6, %v476_v3  ;;  %v250_v9 = vmax.f32 %v246_v4, %v473_v5  ;;  %v477_v17 = vld [vmem:[%s197_s3 + $0x6] sm:$0x3]  ;;  %vm337_vm0 = vcmask 1041408   ;;  %p235_p9 = scmp.lt.s32.totalorder %s674_s12, 1  ;;  %vm349_vm1 = vcmask 0  }
  0x52   : > { %v265_v11 = vmax.f32 %v259_v8, %v478_v7  ;;  %v256_v16 = vmax.f32 %v250_v9, %v475_v10  ;;  %s905_s12 = smov (!%p235_p9, %s674_s12), 1 }
  0x53   : > { %s240_s26 = scalar_lea.vmem %s890_s2, %s905_s12 }
  0x54   : > { %v268_v12 = vsub.f32 %v247_v1, %v265_v11  ;;  %v281_v13 = vsub.f32 %v474_v2, %v265_v11  ;;  %v294_v14 = vsub.f32 %v476_v3, %v265_v11  ;;  %v307_v15 = vsub.f32 %v478_v7, %v265_v11 }
  0x55   : > { %v262_v24 = vmax.f32 %v256_v16, %v477_v17  ;;  %v330_v11 = vld [vmem:[#allocation2] sm:$0x3] }
  0x56   : > { %v269_v18 = vmul.f32 0.25, %v268_v12  ;;  %v282_v19 = vmul.f32 0.25, %v281_v13  ;;  %v295_v20 = vmul.f32 0.25, %v294_v14  ;;  %v308_v21 = vmul.f32 0.25, %v307_v15 }
  0x57   : > { %v266_v27 = vsub.f32 %v246_v4, %v262_v24  ;;  %v279_v28 = vsub.f32 %v473_v5, %v262_v24  ;;  %v292_v31 = vsub.f32 %v475_v10, %v262_v24  ;;  %v305_v38 = vsub.f32 %v477_v17, %v262_v24 }
  0x58   : > { %v270_v22 = vmul.f32 1.442695, %v269_v18  ;;  %v283_v23 = vmul.f32 1.442695, %v282_v19  ;;  %v296_v25 = vmul.f32 1.442695, %v295_v20 }
  0x59   : > { %v309_v26 = vmul.f32 1.442695, %v308_v21  ;;  %v267_v29 = vmul.f32 0.25, %v266_v27  ;;  %v280_v30 = vmul.f32 0.25, %v279_v28  ;;  %v293_v37 = vmul.f32 0.25, %v292_v31 }
  0x5a   : > { %548 = vpow2.f32 %v270_v22  ;;  %v306_v43 = vmul.f32 0.25, %v305_v38 }
  0x5b   : > { %550 = vpow2.f32 %v283_v23  ;;  %v272_v34 = vmul.f32 1.442695, %v267_v29  ;;  %v285_v35 = vmul.f32 1.442695, %v280_v30  ;;  %v298_v42 = vmul.f32 1.442695, %v293_v37 }
  0x5c   : > { %552 = vpow2.f32 %v296_v25  ;;  %v311_v45 = vmul.f32 1.442695, %v306_v43  ;;  %v276_v53 = vsub.f32 %v269_v18, %v267_v29  ;;  %v289_v54 = vsub.f32 %v282_v19, %v280_v30 }
  0x5d   : > { %554 = vpow2.f32 %v309_v26  ;;  %v302_v61 = vsub.f32 %v295_v20, %v293_v37  ;;  %v315_v3 = vsub.f32 %v308_v21, %v306_v43 }
  0x5e   : > { %556 = vpow2.f32 %v272_v34 }
  0x5f   : > { %558 = vpow2.f32 %v285_v35 }
  0x64   : > { %v549_v32 = vpop.eup %548 }
  0x65   : > { %v551_v33 = vpop.eup %550  ;;  %v277_v59 = vmul.f32 %v549_v32, %v276_v53 }
  0x66   : > { %v288_v36 = vadd.f32 %v551_v33, %v549_v32  ;;  %v553_v39 = vpop.eup %552  ;;  %v290_v60 = vmul.f32 %v551_v33, %v289_v54 }
  0x67   : > { %v555_v41 = vpop.eup %554  ;;  %v303_v2 = vmul.f32 %v553_v39, %v302_v61 }
  0x68   : > { %v301_v40 = vadd.f32 %v553_v39, %v288_v36  ;;  %v557_v46 = vpop.eup %556  ;;  %v291_v1 = vadd.f32 %v290_v60, %v277_v59  ;;  %v316_v6 = vmul.f32 %v555_v41, %v315_v3 }
  0x69   : > { %v559_v47 = vpop.eup %558 }
  0x6a   : > { %v314_v44 = vadd.f32 %v555_v41, %v301_v40  ;;  %v287_v49 = vadd.f32 %v559_v47, %v557_v46  ;;  %v304_v5 = vadd.f32 %v303_v2, %v291_v1 }
  0x6c   : > { %560 = vrcp.f32 %v314_v44  ;;  %v317_v7 = vadd.f32 %v316_v6, %v304_v5 }
  0x6d   : > { %562 = vpow2.f32 %v298_v42 }
  0x6e   : > { %564 = vpow2.f32 %v311_v45 }
  0x76   : > { %v561_v48 = vpop.eup %560 }
  0x77   : > { %v319_v50 = vmul.f32 %v561_v48, %v314_v44  ;;  %v563_v51 = vpop.eup %562 }
  0x78   : > { %v300_v55 = vadd.f32 %v563_v51, %v287_v49  ;;  %v565_v57 = vpop.eup %564 }
  0x79   : > { %v320_v52 = vsub.f32 2.0, %v319_v50 }
  0x7a   : > { %v313_v62 = vadd.f32 %v565_v57, %v300_v55 }
  0x7b   : > { %v321_v56 = vmul.f32 %v561_v48, %v320_v52 }
  0x7d   : > { %v322_v58 = vmul.f32 %v321_v56, %v314_v44 }
  0x7f   : > { %v323_v63 = vsub.f32 2.0, %v322_v58 }
  0x81   : > { %v324_v0 = vmul.f32 %v323_v63, %v321_v56 }
  0x83   : > { %v326_v4 = vmul.f32 %v324_v0, %v313_v62  ;;  %v325_v8 = vmul.f32 %v324_v0, %v317_v7 }
  0x85   : > { %566 = vlog2.f32 %v326_v4 }
  0x8f   : > { %v567_v9 = vpop.eup %566 }
  0x90   : > { %v328_v10 = vmul.f32 0.6931472, %v567_v9 }
  0x92   : > { %v329_v12 = vadd.f32 %v328_v10, %v325_v8 }
  0x94   : > { %v331_v13 = vadd.f32 %v330_v11, %v329_v12 }
  0x96   : > { %332 = vst [vmem:[#allocation2] sm:$0x3] %v331_v13 }
  0x9d   : > { %v336_v14 = vld [vmem:[#allocation2] sm:$0x3] }
  0x9e   : > { %v338_v15 = vsel %vm337_vm0, %v336_v14, 0.0 }
  0x9f   : > { %339 = vadd.xlane.f32.xlu0 %v338_v15 }
 0x12c   : > { %v340_v16 = vpop.xlane.xlu0 %339 }
 0x12d   : > { %v341_v17 = vrot.slane %v340_v16, 4 }
 0x12f   : > { %v342_v18 = vadd.f32 %v341_v17, %v340_v16 }
 0x131   : > { %v343_v19 = vrot.slane %v342_v18, 2 }
 0x133   : > { %v344_v20 = vadd.f32 %v343_v19, %v342_v18 }
 0x135   : > { %v345_v21 = vrot.slane %v344_v20, 1 }
 0x137   : > { %v346_v22 = vadd.f32 %v345_v21, %v344_v20 }
 0x139   : > { %483 = vpush %v346_v22 }
 0x16a   : > { %s484_s28 = spop %483 }
 0x16b   : > { %v348_v23 = vstv %s484_s28 }
 0x16c   : > { %350 = vst.msk [vmem:[%s240_s26] sm:$0x1] %vm349_vm1, %v348_v23 }
 0x16d PF: > { %s18_s14 = sadd.s32 1, %s682_s14   ;;  %s897_s9 = smov %s666_s10 }
 0x16e   : > { %p15_p11 = scmp.ge.s32.totalorder %s18_s14, 4   ;;  %s898_s10 = smov %s670_s11 }
 0x16f   : > { %s899_s11 = smov %s753_s21  ;;  %s900_s12 = smov %s678_s13 }
 0x170   : > { %s901_s13 = smov %s903_s16  ;;  %17 = sbr.rel (!%p15_p11) target bundleno = 6 (0x6), region = 95 }
 0x177   :  { %374 = vsyncpa [#allocation4], 1 }
 0x178   :  { %376 = vsyncpa [#allocation4 + $0x1], 1 }
 0x179   :  { %377 = vsyncpa [#allocation6], 1 }
 0x17a   :  { %379 = vsyncpa [#allocation6 + $0x1], 1 }

</bundles_post_ra>
